<compile_context>
chip_gen: v5e
topology: v5e:2x2
jax: 0.10.0
libtpu: 0.0.40
codegen_flags: <defaults>
</compile_context>

<pallas_src>
import functools
import math

import jax
import jax.numpy as jnp
from jax import lax
from jax.experimental import pallas as pl
from jax.experimental.pallas import tpu as pltpu

EXPANSION = 4
BN_EPS = 1e-5


# --------------------------------------------------------------------------
# Kernel
# --------------------------------------------------------------------------
def bottleneck_kernel(x_ref, w1_ref, w2_ref, w3_ref, sb12_ref, sb3_ref, o_ref,
                      *, H, compute_dtype, use_roll):
    """One grid step = block_batch images, W folded into the lane axis.

    x_ref    : (Mblk, W*Cin)     input rows (lane width W*Cin)
    w1_ref   : (W*Cin, W*Pp)     block-diagonal 1x1 conv1
    w2_ref   : (3, W*Pp, W*Pp)   3x3 conv2: one block-banded matrix per kh tap
    w3_ref   : (W*Pp, W*Cout)    block-diagonal 1x1 conv3
    sb12_ref : (4, W*Pp)         rows = [s1, b1, s2, b2] (folded BN, f32)
    sb3_ref  : (2, W*Cout)       rows = [s3, b3]
    o_ref    : (Mblk, W*Cout)
    """
    M = x_ref.shape[0]

    # ---- conv1 (1x1, block-diagonal) + BN1 + ReLU -----------------------
    xc = x_ref[...].astype(compute_dtype)
    t1 = jnp.dot(xc, w1_ref[...], preferred_element_type=jnp.float32)
    t1 = jnp.maximum(t1 * sb12_ref[0:1, :] + sb12_ref[1:2, :], 0.0)  # (M, WPp)

    # ---- conv2 (3x3): kw shift baked into each band; kh = row shift -----
    # Image-boundary masks, built in-kernel (no captured constants); applied
    # unconditionally so the wrapped rows from roll never leak across the
    # top/bottom of an image.
    rid = lax.broadcasted_iota(jnp.int32, (M, 1), 0) % H
    not_top = (rid != 0).astype(jnp.float32)
    not_bot = (rid != H - 1).astype(jnp.float32)

    if use_roll:
        # XLU sublane rotation: row r -> t1[r-1] / t1[r+1] (wrap masked off).
        up = pltpu.roll(t1, shift=1, axis=0)
        dn = pltpu.roll(t1, shift=M - 1, axis=0)
    else:
        # CPU-interpret fallback (filler rows are masked off below anyway).
        up = jnp.concatenate([t1[:1, :], t1[:-1, :]], axis=0)
        dn = jnp.concatenate([t1[1:, :], t1[-1:, :]], axis=0)
    up = up * not_top
    dn = dn * not_bot

    t2 = jnp.dot(t1.astype(compute_dtype), w2_ref[1],
                 preferred_element_type=jnp.float32)
    t2 = t2 + jnp.dot(up.astype(compute_dtype), w2_ref[0],
                      preferred_element_type=jnp.float32)
    t2 = t2 + jnp.dot(dn.astype(compute_dtype), w2_ref[2],
                      preferred_element_type=jnp.float32)
    t2 = jnp.maximum(t2 * sb12_ref[2:3, :] + sb12_ref[3:4, :], 0.0)  # (M, WPp)

    # ---- conv3 (1x1, block-diagonal) + BN3 + residual + ReLU ------------
    t3 = jnp.dot(t2.astype(compute_dtype), w3_ref[...],
                 preferred_element_type=jnp.float32)
    t3 = t3 * sb3_ref[0:1, :] + sb3_ref[1:2, :]                      # (M, WCout)
    # Residual read straight from x_ref (already in VMEM) -> no live f32 copy.
    o_ref[...] = jnp.maximum(t3 + x_ref[...].astype(jnp.float32),
                             0.0).astype(o_ref.dtype)


# --------------------------------------------------------------------------
# Wrapper
# --------------------------------------------------------------------------
def _default_block_batch(B, H, target_rows=256, min_grid=2):
    """>=target_rows rows per grid step, but keep >=min_grid steps (v7x: 2 TCs)."""
    bb = max(1, min(B, target_rows // max(H, 1)))
    if B >= min_grid:
        bb = min(bb, B // min_grid)
    bb = max(bb, 1)
    while B % bb:
        bb -= 1
    return bb


def bottleneck_forward(x_nchw, fp, *, block_batch=None,
                       compute_dtype=jnp.bfloat16, use_xlu_roll=None):
    B, Cin, H, W = x_nchw.shape
    WCin = W * Cin
    WPp = fp["w1"].shape[1]
    WCout = fp["w3"].shape[1]
    assert fp["w1"].shape[0] == WCin
    assert WCout == WCin, "downsample is None => inplanes must equal planes*4"
    assert H % 8 == 0, "row blocks must stay sublane-aligned"

    if block_batch is None:
        block_batch = _default_block_batch(B, H)
    assert B % block_batch == 0
    if use_xlu_roll is None:
        use_xlu_roll = jax.default_backend() == "tpu"

    # NCHW -> NHWC -> (B*H, W*C): the final reshape is free (no transpose) and
    # gives a lane-dense layout for both the input and the output store.
    x2d = jnp.transpose(x_nchw, (0, 2, 3, 1)).reshape(B * H, WCin)

    # bf16 MXU operands on every generation; BN/ReLU/residual stay f32.
    w1 = fp["w1"].astype(compute_dtype)
    w2 = fp["w2"].astype(compute_dtype)          # (3, WPp, WPp)
    w3 = fp["w3"].astype(compute_dtype)

    Mblk = block_batch * H
    kernel = functools.partial(bottleneck_kernel, H=H,
                               compute_dtype=compute_dtype,
                               use_roll=use_xlu_roll)

    out2d = pl.pallas_call(
        kernel,
        out_shape=jax.ShapeDtypeStruct((B * H, WCout), x2d.dtype),
        grid_spec=pltpu.PrefetchScalarGridSpec(
            num_scalar_prefetch=0,
            grid=(B // block_batch,),
            in_specs=[
                pl.BlockSpec((Mblk, WCin), lambda b: (b, 0)),        # x rows
                pl.BlockSpec((WCin, WPp), lambda b: (0, 0)),         # w1 folded
                pl.BlockSpec((3, WPp, WPp), lambda b: (0, 0, 0)),    # w2 bands
                pl.BlockSpec((WPp, WCout), lambda b: (0, 0)),        # w3 folded
                pl.BlockSpec((4, WPp), lambda b: (0, 0)),            # s1,b1,s2,b2
                pl.BlockSpec((2, WCout), lambda b: (0, 0)),          # s3,b3
            ],
            out_specs=pl.BlockSpec((Mblk, WCout), lambda b: (b, 0)),
        ),
        compiler_params=pltpu.CompilerParams(
            dimension_semantics=("parallel",),     # batch shards v7x's 2 TCs
            vmem_limit_bytes=32 * 1024 * 1024),    # headroom on v7x's 64 MiB
    )(x2d, w1, w2, w3, fp["sb12"], fp["sb3"])

    return jnp.transpose(out2d.reshape(B, H, W, Cin), (0, 3, 1, 2))


# --------------------------------------------------------------------------
# Parameter construction / folding
# --------------------------------------------------------------------------
def init_params(key, inplanes, planes):
    """Deterministic synthetic parameters (PyTorch shapes, then re-laid out)."""
    keys = jax.random.split(key, 15)
    exp = EXPANSION

    # PyTorch conv weight layouts: (Cout, Cin, kh, kw)
    w1_t = jax.random.normal(keys[0], (planes, inplanes, 1, 1), jnp.float32) * 0.1
    w2_t = jax.random.normal(keys[1], (planes, planes, 3, 3), jnp.float32) * 0.1
    w3_t = jax.random.normal(keys[2], (planes * exp, planes, 1, 1), jnp.float32) * 0.1

    def folded_bn(kg, kb, km, kv, c):
        gamma = 1.0 + 0.1 * jax.random.normal(kg, (c,), jnp.float32)
        beta = 0.1 * jax.random.normal(kb, (c,), jnp.float32)
        mean = 0.1 * jax.random.normal(km, (c,), jnp.float32)
        var = jax.random.uniform(kv, (c,), jnp.float32, 0.5, 1.5)
        scale = gamma / jnp.sqrt(var + BN_EPS)
        bias = beta - mean * scale
        return scale.reshape(1, c), bias.reshape(1, c)

    s1, b1 = folded_bn(keys[3], keys[4], keys[5], keys[6], planes)
    s2, b2 = folded_bn(keys[7], keys[8], keys[9], keys[10], planes)
    s3, b3 = folded_bn(keys[11], keys[12], keys[13], keys[14], planes * exp)

    return dict(
        w1=jnp.transpose(w1_t[:, :, 0, 0], (1, 0)),          # (Cin, P)
        w2=jnp.transpose(w2_t, (2, 3, 1, 0)),                 # (kh, kw, Ci, Co)
        w3=jnp.transpose(w3_t[:, :, 0, 0], (1, 0)),           # (P, Cout)
        s1=s1, b1=b1, s2=s2, b2=b2, s3=s3, b3=b3,
    )


def fold_params(p, W):
    """Fold W into the lane axis of all weights/BN params (done once, outside
    the kernel). Planes are zero-padded so W*P_pad is a multiple of 128."""
    Cin, P = p["w1"].shape
    Cout = p["w3"].shape[1]
    # Round Pp up so W*Pp >= 128 AND W*Pp % 128 == 0 for general (W, P).
    step = 128 // math.gcd(W, 128)
    Pp = max(P, -(-128 // W))
    Pp = -(-Pp // step) * step
    WPp = W * Pp
    assert WPp % 128 == 0

    w1p = jnp.zeros((Cin, Pp), jnp.float32).at[:, :P].set(p["w1"])
    w2p = jnp.zeros((3, 3, Pp, Pp), jnp.float32).at[:, :, :P, :P].set(p["w2"])
    w3p = jnp.zeros((Pp, Cout), jnp.float32).at[:P, :].set(p["w3"])

    eye_w = jnp.eye(W, dtype=jnp.float32)
    w1f = jnp.kron(eye_w, w1p)                         # (W*Cin, W*Pp) blockdiag
    w3f = jnp.kron(eye_w, w3p)                         # (W*Pp, W*Cout) blockdiag

    # conv2: bake the kw (column) shift of the 3x3 conv into a block-banded
    # matrix per kh tap; the kernel accumulates the three kh bands.
    bands = []
    for dh in range(3):
        band = jnp.zeros((WPp, WPp), jnp.float32)
        for dw in range(3):
            band = band + jnp.kron(jnp.eye(W, k=1 - dw, dtype=jnp.float32),
                                   w2p[dh, dw])
        bands.append(band)
    w2f = jnp.stack(bands, axis=0)                     # (3, W*Pp, W*Pp)

    def tiled(v, c, c_pad):
        vp = jnp.zeros((c_pad,), jnp.float32).at[:c].set(v[0])
        return jnp.tile(vp, W)

    sb12 = jnp.stack([tiled(p["s1"], P, Pp), tiled(p["b1"], P, Pp),
                      tiled(p["s2"], P, Pp), tiled(p["b2"], P, Pp)], axis=0)
    sb3 = jnp.stack([tiled(p["s3"], Cout, Cout),
                     tiled(p["b3"], Cout, Cout)], axis=0)

    return dict(w1=w1f, w2=w2f, w3=w3f, sb12=sb12, sb3=sb3)


# --------------------------------------------------------------------------
# Plain-JAX reference (uses the raw, un-folded parameters)
# --------------------------------------------------------------------------
def ref_forward(x_nchw, p):
    x = jnp.transpose(x_nchw, (0, 2, 3, 1))
    y = jnp.einsum("bhwc,cp->bhwp", x, p["w1"])
    y = jnp.maximum(y * p["s1"][0] + p["b1"][0], 0.0)
    y = lax.conv_general_dilated(
        y, p["w2"], window_strides=(1, 1), padding="SAME",
        dimension_numbers=("NHWC", "HWIO", "NHWC"))
    y = jnp.maximum(y * p["s2"][0] + p["b2"][0], 0.0)
    y = jnp.einsum("bhwp,po->bhwo", y, p["w3"])
    y = y * p["s3"][0] + p["b3"][0]
    y = jnp.maximum(y + x, 0.0)
    return jnp.transpose(y, (0, 3, 1, 2))


# --------------------------------------------------------------------------
if __name__ == "__main__":
    # inplanes == planes * expansion (downsample=None path of the branch block)
    B, inplanes, planes, H, W = 4, 16, 4, 16, 16

    key = jax.random.PRNGKey(0)
    kx, kp = jax.random.split(key)
    x = jax.random.normal(kx, (B, inplanes, H, W), jnp.float32)
    raw = init_params(kp, inplanes, planes)
    folded = fold_params(raw, W)

    ref = jax.block_until_ready(ref_forward(x, raw))

    # 1) default: bf16 MXU operands, auto block_batch (grid stays >= 2 so both
    #    v7x TensorCores get work; rows/step grow toward 256 at larger batch)
    out = jax.block_until_ready(bottleneck_forward(x, folded))
    assert out.shape == ref.shape == (B, planes * EXPANSION, H, W)
    assert jnp.allclose(out, ref, atol=1e-1, rtol=1e-1), (
        float(jnp.max(jnp.abs(out - ref))))

    # 2) f32 MXU operands: tight check of the folding / roll / banding math
    out32 = jax.block_until_ready(
        bottleneck_forward(x, folded, compute_dtype=jnp.float32))
    assert jnp.allclose(out32, ref, atol=2e-2, rtol=2e-2), (
        float(jnp.max(jnp.abs(out32 - ref))))

    print("KERNEL_OK")
</pallas_src>

<mosaic_0001>
module attributes {stable_mosaic.version = 11 : i64} {
  func.func @bottleneck_kernel(%arg0: i32, %arg1: memref<32x256xf32, #tpu.memory_space<vmem>>, %arg2: memref<256x128xbf16, #tpu.memory_space<vmem>>, %arg3: memref<3x128x128xbf16, #tpu.memory_space<vmem>>, %arg4: memref<128x256xbf16, #tpu.memory_space<vmem>>, %arg5: memref<4x128xf32, #tpu.memory_space<vmem>>, %arg6: memref<2x256xf32, #tpu.memory_space<vmem>>, %arg7: memref<32x256xf32, #tpu.memory_space<vmem>>) attributes {dimension_semantics = [#tpu.dimension_semantics<parallel>], iteration_bounds = array<i64: 2>, scalar_prefetch = 0 : i64, scratch_operands = 0 : i64, tpu.core_type = #tpu.core_type<tc>, window_params = [{transform_indices = @transform_0, window_bounds = array<i64: 32, 256>}, {pipeline_mode = #tpu.pipeline_mode<synchronous>, transform_indices = @transform_1, window_bounds = array<i64: 256, 128>}, {pipeline_mode = #tpu.pipeline_mode<synchronous>, transform_indices = @transform_2, window_bounds = array<i64: 3, 128, 128>}, {pipeline_mode = #tpu.pipeline_mode<synchronous>, transform_indices = @transform_3, window_bounds = array<i64: 128, 256>}, {pipeline_mode = #tpu.pipeline_mode<synchronous>, transform_indices = @transform_4, window_bounds = array<i64: 4, 128>}, {pipeline_mode = #tpu.pipeline_mode<synchronous>, transform_indices = @transform_5, window_bounds = array<i64: 2, 256>}, {transform_indices = @transform_6, window_bounds = array<i64: 32, 256>}]} {
    %c0 = arith.constant 0 : index
    %c0_0 = arith.constant 0 : index
    %0 = vector.load %arg1[%c0, %c0_0] : memref<32x256xf32, #tpu.memory_space<vmem>>, vector<32x256xf32>
    %1 = arith.truncf %0 : vector<32x256xf32> to vector<32x256xbf16>
    %c0_1 = arith.constant 0 : index
    %c0_2 = arith.constant 0 : index
    %2 = vector.load %arg2[%c0_1, %c0_2] : memref<256x128xbf16, #tpu.memory_space<vmem>>, vector<256x128xbf16>
    %cst = arith.constant dense<0.000000e+00> : vector<32x128xf32>
    %3 = tpu.matmul %1, %2, %cst {dimension_numbers = #tpu.dot_dimension_numbers<[1], [0], [0], [1], [0, 0, 1, 1], [], []>} : vector<32x256xbf16>, vector<256x128xbf16>, vector<32x128xf32> -> vector<32x128xf32>
    %c0_3 = arith.constant 0 : index
    %c0_4 = arith.constant 0 : index
    %4 = vector.load %arg5[%c0_3, %c0_4] : memref<4x128xf32, #tpu.memory_space<vmem>>, vector<1x128xf32>
    %5 = vector.broadcast %4 : vector<1x128xf32> to vector<32x128xf32>
    %6 = arith.mulf %3, %5 : vector<32x128xf32>
    %c1 = arith.constant 1 : index
    %c0_5 = arith.constant 0 : index
    %7 = vector.load %arg5[%c1, %c0_5] : memref<4x128xf32, #tpu.memory_space<vmem>>, vector<1x128xf32>
    %8 = vector.broadcast %7 : vector<1x128xf32> to vector<32x128xf32>
    %9 = arith.addf %6, %8 : vector<32x128xf32>
    %cst_6 = arith.constant 0.000000e+00 : f32
    %10 = vector.broadcast %cst_6 : f32 to vector<32x128xf32>
    %11 = arith.maximumf %9, %10 : vector<32x128xf32>
    %12 = tpu.iota {dimensions = array<i32: 0>} : vector<32x1xi32>
    %c16_i32 = arith.constant 16 : i32
    %c0_i32 = arith.constant 0 : i32
    %13 = arith.cmpi eq, %c16_i32, %c0_i32 : i32
    %c1_i32 = arith.constant 1 : i32
    %14 = arith.select %13, %c1_i32, %c16_i32 : i32
    %15 = vector.broadcast %14 : i32 to vector<32x1xi32>
    %16 = arith.remsi %12, %15 : vector<32x1xi32>
    %c0_i32_7 = arith.constant 0 : i32
    %17 = vector.broadcast %c0_i32_7 : i32 to vector<32x1xi32>
    %18 = arith.cmpi ne, %16, %17 : vector<32x1xi32>
    %c0_i32_8 = arith.constant 0 : i32
    %19 = vector.broadcast %c0_i32_8 : i32 to vector<32x1xi32>
    %20 = arith.cmpi slt, %16, %19 : vector<32x1xi32>
    %c0_i32_9 = arith.constant 0 : i32
    %21 = arith.cmpi slt, %14, %c0_i32_9 : i32
    %22 = vector.broadcast %21 : i1 to vector<32x1xi1>
    %23 = vector.broadcast %22 : vector<32x1xi1> to vector<32x1xi1>
    %24 = arith.xori %20, %23 : vector<32x1xi1>
    %25 = arith.andi %24, %18 : vector<32x1xi1>
    %26 = vector.broadcast %14 : i32 to vector<32x1xi32>
    %27 = arith.addi %16, %26 : vector<32x1xi32>
    %28 = arith.select %25, %27, %16 : vector<32x1xi1>, vector<32x1xi32>
    %c0_i32_10 = arith.constant 0 : i32
    %29 = vector.broadcast %c0_i32_10 : i32 to vector<32x1xi32>
    %30 = arith.cmpi ne, %28, %29 : vector<32x1xi32>
    %31 = arith.extui %30 : vector<32x1xi1> to vector<32x1xi32>
    %32 = arith.sitofp %31 : vector<32x1xi32> to vector<32x1xf32>
    %c15_i32 = arith.constant 15 : i32
    %33 = vector.broadcast %c15_i32 : i32 to vector<32x1xi32>
    %34 = arith.cmpi ne, %28, %33 : vector<32x1xi32>
    %35 = arith.extui %34 : vector<32x1xi1> to vector<32x1xi32>
    %36 = arith.sitofp %35 : vector<32x1xi32> to vector<32x1xf32>
    %37 = vector.extract_strided_slice %11 {offsets = [0, 0], sizes = [1, 128], strides = [1, 1]} : vector<32x128xf32> to vector<1x128xf32>
    %38 = vector.extract_strided_slice %11 {offsets = [0, 0], sizes = [31, 128], strides = [1, 1]} : vector<32x128xf32> to vector<31x128xf32>
    %39 = tpu.concatenate %37, %38 in 0 : vector<1x128xf32>, vector<31x128xf32> -> vector<32x128xf32>
    %40 = vector.extract_strided_slice %11 {offsets = [1, 0], sizes = [31, 128], strides = [1, 1]} : vector<32x128xf32> to vector<31x128xf32>
    %41 = vector.extract_strided_slice %11 {offsets = [31, 0], sizes = [1, 128], strides = [1, 1]} : vector<32x128xf32> to vector<1x128xf32>
    %42 = tpu.concatenate %40, %41 in 0 : vector<31x128xf32>, vector<1x128xf32> -> vector<32x128xf32>
    %43 = vector.broadcast %32 : vector<32x1xf32> to vector<32x128xf32>
    %44 = arith.mulf %39, %43 : vector<32x128xf32>
    %45 = vector.broadcast %36 : vector<32x1xf32> to vector<32x128xf32>
    %46 = arith.mulf %42, %45 : vector<32x128xf32>
    %47 = arith.truncf %11 : vector<32x128xf32> to vector<32x128xbf16>
    %c1_11 = arith.constant 1 : index
    %c0_12 = arith.constant 0 : index
    %c0_13 = arith.constant 0 : index
    %48 = vector.load %arg3[%c1_11, %c0_12, %c0_13] : memref<3x128x128xbf16, #tpu.memory_space<vmem>>, vector<1x128x128xbf16>
    %49 = vector.shape_cast %48 : vector<1x128x128xbf16> to vector<128x128xbf16>
    %cst_14 = arith.constant dense<0.000000e+00> : vector<32x128xf32>
    %50 = tpu.matmul %47, %49, %cst_14 {dimension_numbers = #tpu.dot_dimension_numbers<[1], [0], [0], [1], [0, 0, 1, 1], [], []>} : vector<32x128xbf16>, vector<128x128xbf16>, vector<32x128xf32> -> vector<32x128xf32>
    %51 = arith.truncf %44 : vector<32x128xf32> to vector<32x128xbf16>
    %c0_15 = arith.constant 0 : index
    %c0_16 = arith.constant 0 : index
    %c0_17 = arith.constant 0 : index
    %52 = vector.load %arg3[%c0_15, %c0_16, %c0_17] : memref<3x128x128xbf16, #tpu.memory_space<vmem>>, vector<1x128x128xbf16>
    %53 = vector.shape_cast %52 : vector<1x128x128xbf16> to vector<128x128xbf16>
    %cst_18 = arith.constant dense<0.000000e+00> : vector<32x128xf32>
    %54 = tpu.matmul %51, %53, %cst_18 {dimension_numbers = #tpu.dot_dimension_numbers<[1], [0], [0], [1], [0, 0, 1, 1], [], []>} : vector<32x128xbf16>, vector<128x128xbf16>, vector<32x128xf32> -> vector<32x128xf32>
    %55 = arith.addf %50, %54 : vector<32x128xf32>
    %56 = arith.truncf %46 : vector<32x128xf32> to vector<32x128xbf16>
    %c2 = arith.constant 2 : index
    %c0_19 = arith.constant 0 : index
    %c0_20 = arith.constant 0 : index
    %57 = vector.load %arg3[%c2, %c0_19, %c0_20] : memref<3x128x128xbf16, #tpu.memory_space<vmem>>, vector<1x128x128xbf16>
    %58 = vector.shape_cast %57 : vector<1x128x128xbf16> to vector<128x128xbf16>
    %cst_21 = arith.constant dense<0.000000e+00> : vector<32x128xf32>
    %59 = tpu.matmul %56, %58, %cst_21 {dimension_numbers = #tpu.dot_dimension_numbers<[1], [0], [0], [1], [0, 0, 1, 1], [], []>} : vector<32x128xbf16>, vector<128x128xbf16>, vector<32x128xf32> -> vector<32x128xf32>
    %60 = arith.addf %55, %59 : vector<32x128xf32>
    %c2_22 = arith.constant 2 : index
    %c0_23 = arith.constant 0 : index
    %61 = vector.load %arg5[%c2_22, %c0_23] : memref<4x128xf32, #tpu.memory_space<vmem>>, vector<1x128xf32>
    %62 = vector.broadcast %61 : vector<1x128xf32> to vector<32x128xf32>
    %63 = arith.mulf %60, %62 : vector<32x128xf32>
    %c3 = arith.constant 3 : index
    %c0_24 = arith.constant 0 : index
    %64 = vector.load %arg5[%c3, %c0_24] : memref<4x128xf32, #tpu.memory_space<vmem>>, vector<1x128xf32>
    %65 = vector.broadcast %64 : vector<1x128xf32> to vector<32x128xf32>
    %66 = arith.addf %63, %65 : vector<32x128xf32>
    %cst_25 = arith.constant 0.000000e+00 : f32
    %67 = vector.broadcast %cst_25 : f32 to vector<32x128xf32>
    %68 = arith.maximumf %66, %67 : vector<32x128xf32>
    %69 = arith.truncf %68 : vector<32x128xf32> to vector<32x128xbf16>
    %c0_26 = arith.constant 0 : index
    %c0_27 = arith.constant 0 : index
    %70 = vector.load %arg4[%c0_26, %c0_27] : memref<128x256xbf16, #tpu.memory_space<vmem>>, vector<128x256xbf16>
    %cst_28 = arith.constant dense<0.000000e+00> : vector<32x256xf32>
    %71 = tpu.matmul %69, %70, %cst_28 {dimension_numbers = #tpu.dot_dimension_numbers<[1], [0], [0], [1], [0, 0, 1, 1], [], []>} : vector<32x128xbf16>, vector<128x256xbf16>, vector<32x256xf32> -> vector<32x256xf32>
    %c0_29 = arith.constant 0 : index
    %c0_30 = arith.constant 0 : index
    %72 = vector.load %arg6[%c0_29, %c0_30] : memref<2x256xf32, #tpu.memory_space<vmem>>, vector<1x256xf32>
    %73 = vector.broadcast %72 : vector<1x256xf32> to vector<32x256xf32>
    %74 = arith.mulf %71, %73 : vector<32x256xf32>
    %c1_31 = arith.constant 1 : index
    %c0_32 = arith.constant 0 : index
    %75 = vector.load %arg6[%c1_31, %c0_32] : memref<2x256xf32, #tpu.memory_space<vmem>>, vector<1x256xf32>
    %76 = vector.broadcast %75 : vector<1x256xf32> to vector<32x256xf32>
    %77 = arith.addf %74, %76 : vector<32x256xf32>
    %c0_33 = arith.constant 0 : index
    %c0_34 = arith.constant 0 : index
    %78 = vector.load %arg1[%c0_33, %c0_34] : memref<32x256xf32, #tpu.memory_space<vmem>>, vector<32x256xf32>
    %79 = arith.addf %77, %78 : vector<32x256xf32>
    %cst_35 = arith.constant 0.000000e+00 : f32
    %80 = vector.broadcast %cst_35 : f32 to vector<32x256xf32>
    %81 = arith.maximumf %79, %80 : vector<32x256xf32>
    %c0_36 = arith.constant 0 : index
    %c0_37 = arith.constant 0 : index
    %82 = vector.load %arg7[%c0_36, %c0_37] : memref<32x256xf32, #tpu.memory_space<vmem>>, vector<32x256xf32>
    tpu.vector_store %arg7[%c0_36, %c0_37], %81 {strides = array<i32>} : memref<32x256xf32, #tpu.memory_space<vmem>>, vector<32x256xf32>,
    return
  }
  func.func @transform_0(%arg0: i32) -> (i32, i32) {
    %c0_i32 = arith.constant 0 : i32
    %c0_i32_0 = arith.constant 0 : i32
    return %arg0, %c0_i32 : i32, i32
  }
  func.func @transform_1(%arg0: i32) -> (i32, i32) {
    %c0_i32 = arith.constant 0 : i32
    %c0_i32_0 = arith.constant 0 : i32
    %c0_i32_1 = arith.constant 0 : i32
    return %c0_i32, %c0_i32_0 : i32, i32
  }
  func.func @transform_2(%arg0: i32) -> (i32, i32, i32) {
    %c0_i32 = arith.constant 0 : i32
    %c0_i32_0 = arith.constant 0 : i32
    %c0_i32_1 = arith.constant 0 : i32
    %c0_i32_2 = arith.constant 0 : i32
    return %c0_i32, %c0_i32_0, %c0_i32_1 : i32, i32, i32
  }
  func.func @transform_3(%arg0: i32) -> (i32, i32) {
    %c0_i32 = arith.constant 0 : i32
    %c0_i32_0 = arith.constant 0 : i32
    %c0_i32_1 = arith.constant 0 : i32
    return %c0_i32, %c0_i32_0 : i32, i32
  }
  func.func @transform_4(%arg0: i32) -> (i32, i32) {
    %c0_i32 = arith.constant 0 : i32
    %c0_i32_0 = arith.constant 0 : i32
    %c0_i32_1 = arith.constant 0 : i32
    return %c0_i32, %c0_i32_0 : i32, i32
  }
  func.func @transform_5(%arg0: i32) -> (i32, i32) {
    %c0_i32 = arith.constant 0 : i32
    %c0_i32_0 = arith.constant 0 : i32
    %c0_i32_1 = arith.constant 0 : i32
    return %c0_i32, %c0_i32_0 : i32, i32
  }
  func.func @transform_6(%arg0: i32) -> (i32, i32) {
    %c0_i32 = arith.constant 0 : i32
    %c0_i32_0 = arith.constant 0 : i32
    return %arg0, %c0_i32 : i32, i32
  }
}

</mosaic_0001>

<bundles_post_ra>
// kernel: tpu_custom_call.1
= control target key start
LH: loop header
LB: loop body
LE: loop exit
PB: predicated region body
PF: predicated region fallthrough
CT: control target
= control target key end

     0   :  { %11 = vsyncpa [#allocation3], 0  ;;  %s2199_s0 = inlined_call_operand.hbm [shape: f32[64,256], index: 0, kind: input, shape index: {}]   ;;  %s2200_s1 = inlined_call_operand.hbm [shape: bf16[256,128], index: 1, kind: input, shape index: {}]   ;;  %s2201_s2 = inlined_call_operand.hbm [shape: bf16[3,128,128], index: 2, kind: input, shape index: {}]   ;;  %s2202_s3 = inlined_call_operand.hbm [shape: bf16[128,256], index: 3, kind: input, shape index: {}]   ;;  %s2203_s4 = inlined_call_operand.hbm [shape: f32[4,128], index: 4, kind: input, shape index: {}]   ;;  %s2204_s5 = inlined_call_operand.vmem [shape: f32[2,256], index: 5, kind: input, shape index: {}]   ;;  %s2205_s6 = inlined_call_operand.hbm [shape: f32[64,256], index: 6, kind: output, shape index: {}]  }
   0x1   :  { %13 = vsyncpa [#allocation3 + $0x1], 0 }
   0x2   :  { %14 = vsyncpa [#allocation6], 0 }
   0x3   :  { %15 = vsyncpa [#allocation9], 0 }
   0x4   :  { %16 = vsyncpa [#allocation4], 0 }
   0x5   :  { %18 = vsyncpa [#allocation4 + $0x1], 0  ;;  %s1937_s21 = smov 0   ;;  %s1939_s22 = smov 0  }
   0x6   :  { %s1941_s23 = smov 0   ;;  %s1943_s24 = smov 0  }
   0x7 LB: > { %s1958_s25 = sadd.s32 4294967295, %s1887_s24   ;;  %s1242_s26 = sadd.s32 4294967294, %s1887_s24   ;;  %s1887_s24 = sphi %s1943_s24, %s2216_s24   ;;  %s1883_s23 = sphi %s1941_s23, %s2215_s23   ;;  %s1879_s22 = sphi %s1939_s22, %s2214_s22   ;;  %s1875_s21 = sphi %s1937_s21, %s2213_s21  }
   0x8   : > { %p44_p0 = scmp.ne.s32.totalorder %s1879_s22, %s1875_s21  ;;  %p45_p1 = scmp.eq.s32.totalorder %s1958_s25, 0 }
   0x9   : > { %p173_p2 = scmp.eq.s32.totalorder %s1958_s25, 1  ;;  %p179_p3 = scmp.eq.s32.totalorder %s1242_s26, 1 }
   0xa   : > { %p1967_p4 = por %p45_p1, %p44_p0  ;;  %p1243_p5 = scmp.ge.s32.totalorder %s1887_s24, 1 }
   0xb   : > { %p1972_p6 = por %p179_p3, %p44_p0  ;;  %p186_p7 = scmp.lt.s32.totalorder %s1887_s24, 3 }
   0xc   : > { %s197_s7 = sshll.u32 %s2200_s1, 4  ;;  %s1889_s9 = smov [#allocation5]   ;;  %s198_s7 = int_to_ptr.hbm [resolvable:$true] %s197_s7 }
   0xd   : > { %p1980_p8 = pnand %p1243_p5, %p186_p7  ;;  %s199_s10 = sshll.u32 %s1889_s9, 4  ;;  %s200_s10 = int_to_ptr.vmem [resolvable:$true] %s199_s10 }
   0xe   : > { %s225_s14 = sshll.u32 %s2202_s3, 4  ;;  %s1890_s15 = smov 64   ;;  %s226_s14 = int_to_ptr.hbm [resolvable:$true] %s225_s14 }
   0xf   : > { %p1583_p9 = pneg %p1980_p8  ;;  %s1891_s16 = smov 4  }
  0x10   : > { %s1892_s17 = smov [#allocation8]   ;;  %s1893_s19 = smov 128  }
  0x11   : > { %p1988_p10 = pnand %p1583_p9, %p45_p1  ;;  %s227_s18 = sshll.u32 %s1892_s17, 4  ;;  %s228_s18 = int_to_ptr.vmem [resolvable:$true] %s227_s18 }
  0x12   : > { %s1894_s20 = smov 8   ;;  %s211_s30 = sshll.u32 %s2201_s2, 4  ;;  %s212_s30 = int_to_ptr.hbm [resolvable:$true] %s211_s30 }
  0x13   : > { %1586 = dma.hbm_to_vmem [thread:$0]  (!%p1988_p10), %s198_s7, 2048, %s200_s10, [#allocation6], %s1890_s15, %s1890_s15, %s1891_s16  }
  0x14   : > { %1592 = dma.hbm_to_vmem [thread:$0]  (!%p1988_p10), %s226_s14, 2048, %s228_s18, [#allocation9], %s1893_s19, %s1893_s19, %s1894_s20  }
  0x15   : > { %s1895_s7 = smov [#allocation7]   ;;  %s240_s13 = sshll.u32 %s2203_s4, 4  ;;  %s241_s13 = int_to_ptr.hbm [resolvable:$true] %s240_s13 }
  0x16   : > { %s213_s9 = sshll.u32 %s1895_s7, 4  ;;  %s1896_s14 = smov [#allocation10]   ;;  %s214_s9 = int_to_ptr.vmem [resolvable:$true] %s213_s9 }
  0x17   : > { %1589 = dma.hbm_to_vmem [thread:$0]  (!%p1988_p10), %s212_s30, 3072, %s214_s9, [#allocation6], %s1890_s15, %s1890_s15, %s1891_s16  }
  0x18   : > { %s242_s17 = sshll.u32 %s1896_s14, 4  ;;  %s2011_s18 = sadd.s32 1, %s1887_s24   ;;  %s243_s17 = int_to_ptr.vmem [resolvable:$true] %s242_s17 }
  0x19   : > { %1595 = dma.hbm_to_vmem [thread:$0]  (!%p1988_p10), %s241_s13, 64, %s243_s17, [#allocation9]  }
  0x1a   : > { %s31_s19 = sadd.s32 1, %s1883_s23  ;;  %s28_s20 = ssub.s32 %s1887_s24, %s2011_s18 }
  0x1b   : > { %p38_p12 = scmp.ne.s32.totalorder %s1883_s23, %s1879_s22  ;;  %p29_p13 = scmp.eq.s32.totalorder %s28_s20, 0 }
  0x1c   : > { %p39_p0 = scmp.eq.s32.totalorder %s1887_s24, 0  ;;  %p1608_p5 = scmp.lt.s32.totalorder %s1887_s24, 2 }
  0x1d   : > { %p2021_p3 = por %p173_p2, %p38_p12  ;;  %s256_s16 = sand.u32 1, %s1883_s23  }
  0x1e   : > { %s2027_s15 = scalar_select %p29_p13, %s1883_s23, %s31_s19  }
  0x1f   : > { %p40_p7 = por %p39_p0, %p38_p12  ;;  %s1249_s11 = sshll.u32 %s256_s16, 6 }
  0x20   : > { %s1496_s29 = sshll.u32 %s1887_s24, 6  ;;  %s260_s10 = scalar_lea.vmem [#allocation2], %s1249_s11 }
  0x21   : > { %s266_s9 = scalar_lea.hbm %s2199_s0, %s1496_s29  ;;  %s269_s12 = sshll.u32 %s260_s10, 4  ;;  %s270_s12 = int_to_ptr.vmem [resolvable:$true] %s269_s12 }
  0x22   : > { %s267_s13 = sshll.u32 %s266_s9, 4  ;;  %p2034_p2 = pnand %p1608_p5, %p40_p7  ;;  %s268_s13 = int_to_ptr.hbm [resolvable:$true] %s267_s13 }
  0x23   : > { %s257_s17 = scalar_lea.sflag [#allocation3], %s256_s16  ;;  %s1783_s19 = sshra.s32 %s268_s13, 4  ;;  %s1784_s19 = int_to_ptr.hbm [resolvable:$true] %s1783_s19 }
  0x24   : > { %s1785_s20 = scalar_lea.hbm %s1784_s19, 64  ;;  %p1787_p10 = pneg %p2034_p2 }
  0x25   : > { %p1786_p9 = scmp.ne.s32.totalorder %s1784_s19, %s1785_s20  ;;  %s1790_s30 = scalar_lea.hbm %s2199_s0, 128 }
  0x26   : > { %p1791_p0 = scmp.lt.s32.totalorder %s1784_s19, %s2199_s0  ;;  %p1792_p5 = scmp.lt.s32.totalorder %s1790_s30, %s1785_s20 }
  0x27   : > { %p1788_p12 = pnand %p1787_p10, %p1786_p9 }
  0x28   : > { %p1793_p7 = por %p1792_p5, %p1791_p0 }
  0x29   : > { %p1789_p13 = pneg %p1788_p12 }
  0x2b   : > { %p1794_p11 = pnand %p1793_p7, %p1789_p13 }
  0x2d   : > { %1797 = shalt.err (!%p1794_p11)
}
  0x2e   : > { %s1897_s16 = smov 256   ;;  %s1898_s10 = smov 16  }
  0x2f   : > { %1599 = dma.hbm_to_vmem [thread:$0]  (!%p2034_p2), %s268_s13, 1024, %s270_s12, %s257_s17, %s1897_s16, %s1897_s16, %s1898_s10  }
  0x30   : > { %281 = sbr.rel (%p1980_p8) target bundleno = 569 (0x239), region = 44  ;;  %s2051_s29 = sand.u32 (!%p1980_p8), 1, %s1879_s22  }
  0x31   : > { %s1254_s19 = sshll.u32 (!%p1980_p8), %s2051_s29, 6  ;;  %s284_s20 = scalar_lea.sflag (!%p1980_p8), [#allocation3], %s2051_s29 }
  0x32   : > { %s2057_s11 = scalar_lea.vmem (!%p1980_p8), [#allocation2], %s1254_s19 }
  0x35   : > { %1858 = dma.done.wait (%p1967_p4), %s284_s20, 1024  }
  0x36   : > { %1860 = vsyncadd (%p1967_p4), %s284_s20, 4294966272 }
  0x37   : > { %1862 = dma.done.wait (%p45_p1), [#allocation6], 5120  }
  0x38   : > { %1864 = vsyncadd (%p45_p1), [#allocation6], 4294962176 }
  0x39   : > { %1866 = dma.done.wait (%p45_p1), [#allocation9], 2112  }
  0x3a   : > { %1868 = vsyncadd (%p45_p1), [#allocation9], 4294965184  ;;  %v1504_v0 = vld [vmem:[#allocation5 + $0x38] sm:$0xff]  ;;  %v1503_v2 = vld [vmem:[#allocation5 + $0x30] sm:$0xff]  ;;  %v533_v55 = vlaneseq  ;;  %vm614_vm1 = vcmask 1040384   ;;  %vm627_vm3 = vcmask 1046528  }
  0x3b   : > { %v1512_v1 = vld [vmem:[#allocation5 + $0x78] sm:$0xff]  ;;  %479 = vmatpush.bf16.msra.mxu0 %v1504_v0  ;;  %v1511_v3 = vld [vmem:[#allocation5 + $0x70] sm:$0xff]  ;;  %v1502_v4 = vld [vmem:[#allocation5 + $0x28] sm:$0xff]  ;;  %s2148_s14 = scalar_lea.vmem [#allocation11], %s1254_s19  ;;  %s1554_s17 = sshll.u32 %s1958_s25, 6 }
  0x3c   : > { %498 = vmatpush.bf16.msra.mxu1 %v1512_v1  ;;  %v1510_v5 = vld [vmem:[#allocation5 + $0x68] sm:$0xff]  ;;  %v1501_v6 = vld [vmem:[#allocation5 + $0x20] sm:$0xff]  ;;  %v1500_v8 = vld [vmem:[#allocation5 + $0x18] sm:$0xff]  ;;  %v2108_v59 = vshrl.u32 %v533_v55, 7  ;;  %s1127_s9 = scalar_lea.hbm %s2205_s6, %s1554_s17  ;;  %s1128_s16 = sshll.u32 %s2148_s14, 4  ;;  %s1129_s16 = int_to_ptr.vmem [resolvable:$true] %s1128_s16 }
  0x3d   : > { %v1509_v7 = vld [vmem:[#allocation5 + $0x60] sm:$0xff]  ;;  %v1508_v9 = vld [vmem:[#allocation5 + $0x58] sm:$0xff]  ;;  %v1499_v12 = vld [vmem:[#allocation5 + $0x10] sm:$0xff]  ;;  %s1130_s10 = sshll.u32 %s1127_s9, 4  ;;  %s1115_s25 = scalar_lea.sflag [#allocation4], %s2051_s29  ;;  %s1131_s10 = int_to_ptr.hbm [resolvable:$true] %s1130_s10 }
  0x3e   : > { %v1520_v10 = vld [vmem:[#allocation7 + $0x78] sm:$0xff]  ;;  %v1507_v13 = vld [vmem:[#allocation5 + $0x50] sm:$0xff]  ;;  %v1498_v16 = vld [vmem:[#allocation5 + $0x8] sm:$0xff]  ;;  %v542_v0 = vand.u32 15, %v2108_v59  ;;  %s1827_s19 = sshra.s32 %s1131_s10, 4  ;;  %s1833_s8 = scalar_lea.hbm %s2205_s6, 128  ;;  %s1828_s19 = int_to_ptr.hbm [resolvable:$true] %s1827_s19 }
  0x3f   : > { %480 = vmatpush.bf16.msra.mxu0 %v1503_v2  ;;  %v1528_v11 = vld [vmem:[#allocation7 + $0x38] sm:$0xff]  ;;  %800 = vmatpush.bf16.msra.mxu3 %v1520_v10  ;;  %v1519_v14 = vld [vmem:[#allocation7 + $0x70] sm:$0xff]  ;;  %v1506_v17 = vld [vmem:[#allocation5 + $0x48] sm:$0xff]  ;;  %s1829_s20 = scalar_lea.hbm %s1828_s19, 64  ;;  %p1834_p11 = scmp.lt.s32.totalorder %s1828_s19, %s2205_s6 }
  0x40   : > { %499 = vmatpush.bf16.msra.mxu1 %v1511_v3  ;;  %733 = vmatpush.bf16.msra.mxu2 %v1528_v11  ;;  %v1527_v15 = vld [vmem:[#allocation7 + $0x30] sm:$0xff]  ;;  %v1518_v18 = vld [vmem:[#allocation7 + $0x68] sm:$0xff]  ;;  %v1497_v20 = vld [vmem:[#allocation5] sm:$0xff]  ;;  %vm586_vm0 = vcmp.ne.s32.totalorder %v542_v0, 0  ;;  %p1830_p1 = scmp.ne.s32.totalorder %s1828_s19, %s1829_s20  ;;  %p1835_p2 = scmp.lt.s32.totalorder %s1833_s8, %s1829_s20 }
  0x41   : > { %v1526_v19 = vld [vmem:[#allocation7 + $0x28] sm:$0xff]  ;;  %v1505_v21 = vld [vmem:[#allocation5 + $0x40] sm:$0xff]  ;;  %v2075_v23 = vld [vmem:[%s2057_s11 + $0x10] sm:$0xff] }
  0x42   : > { %v2072_v22 = vld [vmem:[%s2057_s11] sm:$0xff]  ;;  %v2078_v24 = vld [vmem:[%s2057_s11 + $0x8] sm:$0xff]  ;;  %v2081_v25 = vld [vmem:[%s2057_s11 + $0x18] sm:$0xff]  ;;  %p1831_p4 = pnand %p1830_p1, %p2021_p3  ;;  %p1836_p9 = por %p1835_p2, %p1834_p11 }
  0x43   : > { %481 = vmatpush.bf16.msra.mxu0 %v1502_v4  ;;  %801 = vmatpush.bf16.msra.mxu3 %v1519_v14  ;;  %v347_v26 = vpack.c.bf16 %v2075_v23, %v2072_v22  ;;  %v348_v27 = vpack.c.bf16 %v2081_v25, %v2078_v24  ;;  %v2088_v28 = vld [vmem:[%s2057_s11 + $0x20] sm:$0xff]  ;;  %v2091_v29 = vld [vmem:[%s2057_s11 + $0x30] sm:$0xff]  ;;  %v2094_v30 = vld [vmem:[%s2057_s11 + $0x28] sm:$0xff] }
  0x44   : > { %500 = vmatpush.bf16.msra.mxu1 %v1510_v5  ;;  %734 = vmatpush.bf16.msra.mxu2 %v1527_v15  ;;  %v2097_v31 = vld [vmem:[%s2057_s11 + $0x38] sm:$0xff]  ;;  %v349_v32 = vpack.c.bf16 %v2091_v29, %v2088_v28  ;;  %v1517_v34 = vld [vmem:[#allocation7 + $0x60] sm:$0xff]  ;;  %v1535_v38 = vld [vmem:[#allocation7 + $0xb0] sm:$0xff]  ;;  %v535_v5 = vadd.s32 8, %v2108_v59  ;;  %p1832_p8 = pneg %p1831_p4 }
  0x45   : > { %v350_v33 = vpack.c.bf16 %v2097_v31, %v2094_v30  ;;  %v1536_v35 = vld [vmem:[#allocation7 + $0xb8] sm:$0xff]  ;;  %v1525_v36 = vld [vmem:[#allocation7 + $0x20] sm:$0xff]  ;;  %v1515_v40 = vld [vmem:[#allocation7 + $0x50] sm:$0xff] }
  0x46   : > { %v1516_v37 = vld [vmem:[#allocation7 + $0x58] sm:$0xff]  ;;  %v1534_v41 = vld [vmem:[#allocation7 + $0xa8] sm:$0xff]  ;;  %v1523_v42 = vld [vmem:[#allocation7 + $0x10] sm:$0xff]  ;;  %p1837_p10 = pnand %p1836_p9, %p1832_p8 }
  0x47   : > { %482 = vmatpush.bf16.msra.mxu0 %v1501_v6  ;;  %802 = vmatpush.bf16.msra.mxu3 %v1518_v18  ;;  %v1524_v39 = vld [vmem:[#allocation7 + $0x18] sm:$0xff]  ;;  %v1514_v43 = vld [vmem:[#allocation7 + $0x48] sm:$0xff]  ;;  %v1533_v44 = vld [vmem:[#allocation7 + $0xa0] sm:$0xff] }
  0x48   : > { %501 = vmatpush.bf16.msra.mxu1 %v1509_v7  ;;  %735 = vmatpush.bf16.msra.mxu2 %v1526_v19  ;;  %v1522_v45 = vld [vmem:[#allocation7 + $0x8] sm:$0xff]  ;;  %v1513_v46 = vld [vmem:[#allocation7 + $0x40] sm:$0xff]  ;;  %v1532_v47 = vld [vmem:[#allocation7 + $0x98] sm:$0xff]  ;;  %v1899_v7 = vmov 0.0  }
  0x49   : > { %v1521_v48 = vld [vmem:[#allocation7] sm:$0xff]  ;;  %v1531_v49 = vld [vmem:[#allocation7 + $0x90] sm:$0xff]  ;;  %v1530_v50 = vld [vmem:[#allocation7 + $0x88] sm:$0xff] }
  0x4a   : > { %v1529_v51 = vld [vmem:[#allocation7 + $0x80] sm:$0xff] }
  0x4b   : > { %483 = vmatpush.bf16.msra.mxu0 %v1500_v8  ;;  %803 = vmatpush.bf16.msra.mxu3 %v1517_v34  ;;  %v2103_v52 = vld [vmem:[#allocation10] ss:$0 sm:$0xff]  ;;  %v2105_v57 = vld [vmem:[#allocation10 + $0x1] ss:$0 sm:$0xff]  ;;  %v1324_v8 = vsel %vm586_vm0, 1.0, %v1899_v7 }
  0x4c   : > { %502 = vmatpush.bf16.msra.mxu1 %v1508_v9  ;;  %736 = vmatpush.bf16.msra.mxu2 %v1525_v36  ;;  %v1474_v34 = vld [vmem:[#allocation8 + $0x60] sm:$0xf] }
  0x4f   : > { %484 = vmatpush.bf16.msra.mxu0 %v1499_v12  ;;  %804 = vmatpush.bf16.msra.mxu3 %v1516_v37 }
  0x50   : > { %503 = vmatpush.bf16.msra.mxu1 %v1507_v13  ;;  %737 = vmatpush.bf16.msra.mxu2 %v1524_v39  ;;  %v1476_v39 = vld [vmem:[#allocation8 + $0x68] sm:$0xf0] }
  0x53   : > { %485 = vmatpush.bf16.msra.mxu0 %v1498_v16  ;;  %805 = vmatpush.bf16.msra.mxu3 %v1515_v40  ;;  %v549_v16 = vand.u32 15, %v535_v5 }
  0x54   : > { %504 = vmatpush.bf16.msra.mxu1 %v1506_v17  ;;  %738 = vmatpush.bf16.msra.mxu2 %v1523_v42  ;;  %v536_v17 = vadd.s32 16, %v2108_v59 }
  0x55   : > { %vm599_vm2 = vcmp.ne.s32.totalorder %v549_v16, 15 }
  0x57   : > { %486 = vmatpush.bf16.msra.mxu0 %v1497_v20  ;;  %806 = vmatpush.bf16.msra.mxu3 %v1514_v43  ;;  %v1482_v20 = vld [vmem:[#allocation8 + $0x70] sm:$0xf] }
  0x58   : > { %505 = vmatpush.bf16.msra.mxu1 %v1505_v21  ;;  %739 = vmatpush.bf16.msra.mxu2 %v1522_v45  ;;  %v1552_v21 = vld [vmem:[#allocation8 + $0x74] sm:$0xf0]  ;;  %v556_v45 = vand.u32 15, %v536_v17  ;;  %v1458_v17 = vld [vmem:[#allocation8 + $0x40] sm:$0xf] }
  0x5a   : > { %487 = vmatmul.bf16.vlgmr.msra.gmra.mxu0 %v347_v26  ;;  %v1551_v26 = vld [vmem:[#allocation8 + $0x74] sm:$0xf]  ;;  %vm588_vm4 = vcmp.ne.s32.totalorder %v556_v45, 0 }
  0x5b   : > { %506 = vmatmul.bf16.vlgmr.msra.gmra.mxu1 %v348_v27  ;;  %886 = vmatpush.bf16.msrb.mxu0 %v1536_v35 }
  0x5c   : > { %807 = vmatpush.bf16.msra.mxu3 %v1513_v46  ;;  %740 = vmatpush.bf16.msra.mxu2 %v1521_v48  ;;  %v1326_v48 = vsel %vm599_vm2, 1.0, %v1899_v7 }
  0x5f   : > { %887 = vmatpush.bf16.msrb.mxu0 %v1535_v38 }
  0x60   : > { %1555 = vmatpush.bf16.msrb.mxu3 %v1536_v35  ;;  %v1550_v35 = vld [vmem:[#allocation8 + $0x64] sm:$0xf0] }
  0x61   : > { %v1475_v40 = vor.u32 %v1550_v35, %v1474_v34  ;;  %v1452_v34 = vld [vmem:[#allocation8 + $0x38] sm:$0xf0] }
  0x63   : > { %888 = vmatpush.bf16.msrb.mxu0 %v1534_v41 }
  0x64   : > { %1556 = vmatpush.bf16.msrb.mxu3 %v1535_v38  ;;  %v1549_v38 = vld [vmem:[#allocation8 + $0x64] sm:$0xf] }
  0x65   : > { %v1479_v42 = vor.u32 %v1549_v38, %v1476_v39  ;;  %v1541_v38 = vld [vmem:[#allocation8 + $0x24] sm:$0xf] }
  0x67   : > { %889 = vmatpush.bf16.msrb.mxu0 %v1533_v44 }
  0x68   : > { %1557 = vmatpush.bf16.msrb.mxu3 %v1534_v41 }
  0x6a   : > { %492 = vmatmul.bf16.gmra.mxu0 %v349_v32  ;;  %v1483_v32 = vor.u32 %v1552_v21, %v1482_v20 }
  0x6b   : > { %511 = vmatmul.bf16.gmra.mxu1 %v350_v33  ;;  %890 = vmatpush.bf16.msrb.mxu0 %v1532_v47  ;;  %v1484_v33 = vld [vmem:[#allocation8 + $0x78] sm:$0xf0] }
  0x6c   : > { %1558 = vmatpush.bf16.msrb.mxu3 %v1533_v44  ;;  %v1487_v37 = vor.u32 %v1551_v26, %v1484_v33  ;;  %1023 = vmatpush.bf16.msrb.mxu1 %v1483_v32  ;;  %v1450_v26 = vld [vmem:[#allocation8 + $0x30] sm:$0xf]  ;;  %v1543_v33 = vld [vmem:[#allocation8 + $0x34] sm:$0xf] }
  0x6d   : > { %v1455_v35 = vor.u32 %v1543_v33, %v1452_v34  ;;  %v1061_v34 = vld [vmem:[%s2204_s5] ss:$2 sm:$0x3] }
  0x6e   : > { %1042 = vmatpush.bf16.msrb.mxu2 %v1487_v37  ;;  %v1542_v37 = vld [vmem:[#allocation8 + $0x24] sm:$0xf0] }
  0x6f   : > { %891 = vmatpush.bf16.msrb.mxu0 %v1531_v49 }
  0x70   : > { %1559 = vmatpush.bf16.msrb.mxu3 %v1532_v47  ;;  %1024 = vmatpush.bf16.msrb.mxu1 %v1475_v40  ;;  %v1444_v40 = vld [vmem:[#allocation8 + $0x28] sm:$0xf0] }
  0x72   : > { %1043 = vmatpush.bf16.msrb.mxu2 %v1479_v42  ;;  %v1434_v42 = vld [vmem:[#allocation8 + $0x10] sm:$0xf] }
  0x73   : > { %892 = vmatpush.bf16.msrb.mxu0 %v1530_v50 }
  0x74   : > { %1560 = vmatpush.bf16.msrb.mxu3 %v1531_v49 }
  0x77   : > { %893 = vmatpush.bf16.msrb.mxu0 %v1529_v51 }
  0x78   : > { %1561 = vmatpush.bf16.msrb.mxu3 %v1530_v50 }
  0x7c   : > { %1562 = vmatpush.bf16.msrb.mxu3 %v1529_v51 }
  0xd7   : > { %v488_v53 = vpop.f32.mrf.mxu0 }
  0xd8   : > { %v507_v54 = vpop.f32.mrf.mxu1 }
  0xd9   : > { %v508_v56 = vadd.f32 %v507_v54, %v488_v53 }
  0xdb   : > { %v519_v58 = vmul.f32 %v2103_v52, %v508_v56 }
  0xdd   : > { %v525_v60 = vadd.f32 %v2105_v57, %v519_v58 }
  0xdf   : > { %v2111_v61 = vmax.f32 %v525_v60, 0.0  ;;  %v490_v62 = vpop.f32.mrf.mxu0 }
  0xe0   : > { %v509_v63 = vpop.f32.mrf.mxu1 }
  0xe1   : > { %v510_v1 = vadd.f32 %v509_v63, %v490_v62  ;;  %v615_v3 = vrot.slane %v2111_v61, 7  ;;  %v628_v51 = vrot.slane %v2111_v61, 1  ;;  %v1325_v63 = vsel %vm588_vm4, 1.0, %v1899_v7 }
  0xe3   : > { %v520_v2 = vmul.f32 %v2103_v52, %v510_v1  ;;  %v626_v9 = vsel %vm614_vm1, %v2111_v61, %v615_v3 }
  0xe4   : > { %v640_v15 = vmul.f32 %v1324_v8, %v626_v9 }
  0xe5   : > { %v526_v4 = vadd.f32 %v2105_v57, %v520_v2 }
  0xe7   : > { %v530_v6 = vmax.f32 %v526_v4, 0.0  ;;  %v493_v10 = vpop.f32.mrf.mxu0 }
  0xe8   : > { %v512_v11 = vpop.f32.mrf.mxu1 }
  0xe9   : > { %v513_v12 = vadd.f32 %v512_v11, %v493_v10  ;;  %v648_v13 = vpack.c.bf16 %v530_v6, %v2111_v61  ;;  %v616_v14 = vrot.slane %v530_v6, 7  ;;  %v629_v49 = vrot.slane %v530_v6, 1  ;;  %v1466_v11 = vld [vmem:[#allocation8 + $0x50] sm:$0xf] }
  0xeb   : > { %v521_v18 = vmul.f32 %v2103_v52, %v513_v12  ;;  %808 = vmatmul.bf16.vlgmr.msra.gmra.mxu3 %v648_v13  ;;  %v617_v19 = vsel %vm614_vm1, %v615_v3, %v616_v14  ;;  %v630_v58 = vsel %vm627_vm3, %v628_v51, %v629_v49  ;;  %v1548_v12 = vld [vmem:[#allocation8 + $0x54] sm:$0xf0]  ;;  %v1547_v13 = vld [vmem:[#allocation8 + $0x54] sm:$0xf] }
  0xec   : > { %v667_v27 = vpack.c.bf16 %v617_v19, %v640_v15  ;;  %v1468_v15 = vld [vmem:[#allocation8 + $0x58] sm:$0xf0]  ;;  %v1545_v19 = vld [vmem:[#allocation8 + $0x44] sm:$0xf] }
  0xed   : > { %v527_v36 = vadd.f32 %v2105_v57, %v521_v18  ;;  %v1471_v16 = vor.u32 %v1547_v13, %v1468_v15  ;;  %v1546_v18 = vld [vmem:[#allocation8 + $0x44] sm:$0xf0] }
  0xee   : > { %741 = vmatmul.bf16.vlgmr.msra.gmra.mxu2 %v667_v27  ;;  %v1459_v20 = vor.u32 %v1546_v18, %v1458_v17  ;;  %v1544_v27 = vld [vmem:[#allocation8 + $0x34] sm:$0xf0] }
  0xef   : > { %v531_v41 = vmax.f32 %v527_v36, 0.0  ;;  %v495_v43 = vpop.f32.mrf.mxu0  ;;  %1044 = vmatpush.bf16.msrb.mxu2 %v1471_v16  ;;  %v1451_v32 = vor.u32 %v1544_v27, %v1450_v26  ;;  %v1442_v36 = vld [vmem:[#allocation8 + $0x20] sm:$0xf] }
  0xf0   : > { %v514_v44 = vpop.f32.mrf.mxu1  ;;  %v1443_v39 = vor.u32 %v1542_v37, %v1442_v36  ;;  %v1063_v36 = vperm.slane %v1061_v34, 0 }
  0xf1   : > { %v631_v46 = vrot.slane %v531_v41, 1  ;;  %v515_v47 = vadd.f32 %v514_v44, %v495_v43  ;;  %v618_v54 = vrot.slane %v531_v41, 7  ;;  %v1540_v43 = vld [vmem:[#allocation8 + $0x14] sm:$0xf0]  ;;  %v1539_v44 = vld [vmem:[#allocation8 + $0x14] sm:$0xf] }
  0xf2   : > { %v1435_v45 = vor.u32 %v1540_v43, %v1434_v42 }
  0xf3   : > { %v522_v50 = vmul.f32 %v2103_v52, %v515_v47  ;;  %v632_v53 = vsel %vm627_vm3, %v629_v49, %v631_v46  ;;  %v619_v0 = vsel %vm614_vm1, %v616_v14, %v618_v54  ;;  %v537_v52 = vadd.s32 24, %v2108_v59  ;;  %v1538_v49 = vld [vmem:[#allocation8 + $0x4] sm:$0xf0] }
  0xf4   : > { %v645_v55 = vmul.f32 %v1326_v48, %v632_v53  ;;  %v642_v2 = vmul.f32 %v1325_v63, %v619_v0  ;;  %v1467_v14 = vor.u32 %v1548_v12, %v1466_v11  ;;  %v1426_v48 = vld [vmem:[#allocation8] sm:$0xf]  ;;  %v1428_v53 = vld [vmem:[#allocation8 + $0x8] sm:$0xf0] }
  0xf5   : > { %v528_v56 = vadd.f32 %v2105_v57, %v522_v50  ;;  %v563_v4 = vand.u32 15, %v537_v52  ;;  %v1537_v50 = vld [vmem:[#allocation8 + $0x4] sm:$0xf]  ;;  %v1427_v51 = vor.u32 %v1538_v49, %v1426_v48  ;;  %v1661_v0 = vld [vmem:[#allocation10 + $0x2] ss:$0 sm:$0xff] }
  0xf6   : > { %v819_v60 = vpack.c.bf16 %v645_v55, %v630_v58  ;;  %1025 = vmatpush.bf16.msrb.mxu1 %v1467_v14 }
  0xf7   : > { %v532_v62 = vmax.f32 %v528_v56, 0.0  ;;  %vm601_vm5 = vcmp.ne.s32.totalorder %v563_v4, 15 }
  0xf8   : > { %894 = vmatmul.bf16.vlgmr.msrb.gmra.mxu0 %v819_v60  ;;  %v1327_v6 = vsel %vm601_vm5, 1.0, %v1899_v7  ;;  %v1460_v7 = vld [vmem:[#allocation8 + $0x48] sm:$0xf0] }
  0xf9   : > { %v649_v61 = vpack.c.bf16 %v532_v62, %v531_v41  ;;  %v620_v1 = vrot.slane %v532_v62, 7  ;;  %v633_v57 = vrot.slane %v532_v62, 1  ;;  %v1463_v21 = vor.u32 %v1545_v19, %v1460_v7 }
  0xfa   : > { %1026 = vmatpush.bf16.msrb.mxu1 %v1459_v20  ;;  %v1447_v41 = vor.u32 %v1541_v38, %v1444_v40 }
  0xfb   : > { %813 = vmatmul.bf16.gmra.mxu3 %v649_v61  ;;  %v621_v3 = vsel %vm614_vm1, %v618_v54, %v620_v1  ;;  %v639_v8 = vsel %vm627_vm3, %v633_v57, %v532_v62  ;;  %v634_v10 = vsel %vm627_vm3, %v631_v46, %v633_v57  ;;  %1045 = vmatpush.bf16.msrb.mxu2 %v1463_v21  ;;  %v1436_v46 = vld [vmem:[#allocation8 + $0x18] sm:$0xf0]  ;;  %v1662_v1 = vld [vmem:[#allocation10 + $0x3] ss:$0 sm:$0xff] }
  0xfc   : > { %v668_v5 = vpack.c.bf16 %v621_v3, %v642_v2  ;;  %v647_v9 = vmul.f32 %v1327_v6, %v639_v8  ;;  %v1439_v47 = vor.u32 %v1539_v44, %v1436_v46  ;;  %v1431_v54 = vor.u32 %v1537_v50, %v1428_v53 }
  0xfe   : > { %746 = vmatmul.bf16.gmra.mxu2 %v668_v5  ;;  %v820_v59 = vpack.c.bf16 %v647_v9, %v634_v10  ;;  %1027 = vmatpush.bf16.msrb.mxu1 %v1451_v32 }
  0xff   : > { %1046 = vmatpush.bf16.msrb.mxu2 %v1455_v35  ;;  %v1488_v35 = vld [vmem:[%s2204_s5 + $0x1] ss:$2 sm:$0x3] }
 0x100   : > { %v1078_v37 = vperm.slane %v1488_v35, 0  ;;  %v1079_v43 = vperm.slane %v1488_v35, 1 }
 0x102   : > { %1028 = vmatpush.bf16.msrb.mxu1 %v1443_v39 }
 0x103   : > { %1047 = vmatpush.bf16.msrb.mxu2 %v1447_v41  ;;  %v1064_v41 = vperm.slane %v1061_v34, 1 }
 0x106   : > { %1029 = vmatpush.bf16.msrb.mxu1 %v1435_v45 }
 0x107   : > { %1048 = vmatpush.bf16.msrb.mxu2 %v1439_v47 }
 0x10a   : > { %1030 = vmatpush.bf16.msrb.mxu1 %v1427_v51 }
 0x10b   : > { %899 = vmatmul.bf16.vlgmr.msrb.gmra.mxu3 %v820_v59  ;;  %1049 = vmatpush.bf16.msrb.mxu2 %v1431_v54 }
 0x16e   : > { %v809_v55 = vpop.f32.mrf.mxu3 }
 0x171   : > { %v742_v56 = vpop.f32.mrf.mxu2 }
 0x172   : > { %v810_v60 = vadd.f32 %v809_v55, %v742_v56 }
 0x175   : > { %v895_v58 = vpop.f32.mrf.mxu0 }
 0x176   : > { %v811_v62 = vpop.f32.mrf.mxu3  ;;  %v905_v63 = vadd.f32 %v895_v58, %v810_v60 }
 0x178   : > { %v911_v61 = vmul.f32 %v1661_v0, %v905_v63 }
 0x179   : > { %v744_v52 = vpop.f32.mrf.mxu2 }
 0x17a   : > { %v812_v2 = vadd.f32 %v811_v62, %v744_v52  ;;  %v917_v57 = vadd.f32 %v1662_v1, %v911_v61 }
 0x17c   : > { %v921_v9 = vmax.f32 %v917_v57, 0.0 }
 0x17d   : > { %v897_v3 = vpop.f32.mrf.mxu0 }
 0x17e   : > { %v906_v4 = vadd.f32 %v897_v3, %v812_v2  ;;  %v814_v5 = vpop.f32.mrf.mxu3 }
 0x180   : > { %v912_v6 = vmul.f32 %v1661_v0, %v906_v4 }
 0x181   : > { %v747_v12 = vpop.f32.mrf.mxu2 }
 0x182   : > { %v918_v8 = vadd.f32 %v1662_v1, %v912_v6  ;;  %v815_v14 = vadd.f32 %v814_v5, %v747_v12 }
 0x184   : > { %v922_v10 = vmax.f32 %v918_v8, 0.0 }
 0x186   : > { %v816_v59 = vpop.f32.mrf.mxu3  ;;  %v925_v11 = vpack.c.bf16 %v922_v10, %v921_v9 }
 0x188   : > { %1031 = vmatmul.bf16.vlgmr.msrb.gmra.mxu1 %v925_v11  ;;  %1050 = vmatmul.bf16.vlgmr.msrb.gmra.mxu2 %v925_v11 }
 0x189   : > { %v749_v16 = vpop.f32.mrf.mxu2 }
 0x18a   : > { %v817_v17 = vadd.f32 %v816_v59, %v749_v16 }
 0x18e   : > { %v900_v13 = vpop.f32.mrf.mxu3 }
 0x18f   : > { %v907_v15 = vadd.f32 %v900_v13, %v815_v14 }
 0x191   : > { %v913_v18 = vmul.f32 %v1661_v0, %v907_v15 }
 0x193   : > { %v919_v21 = vadd.f32 %v1662_v1, %v913_v18 }
 0x195   : > { %v923_v27 = vmax.f32 %v919_v21, 0.0 }
 0x196   : > { %v902_v19 = vpop.f32.mrf.mxu3 }
 0x197   : > { %v908_v20 = vadd.f32 %v902_v19, %v817_v17 }
 0x199   : > { %v914_v7 = vmul.f32 %v1661_v0, %v908_v20 }
 0x19b   : > { %v920_v26 = vadd.f32 %v1662_v1, %v914_v7 }
 0x19d   : > { %v924_v32 = vmax.f32 %v920_v26, 0.0 }
 0x19f   : > { %v926_v33 = vpack.c.bf16 %v924_v32, %v923_v27 }
 0x1a1   : > { %1036 = vmatmul.bf16.gmra.mxu1 %v926_v33  ;;  %1055 = vmatmul.bf16.gmra.mxu2 %v926_v33 }
 0x205   : > { %v1032_v38 = vpop.f32.mrf.mxu1 }
 0x206   : > { %v1067_v39 = vmul.f32 %v1063_v36, %v1032_v38 }
 0x208   : > { %v1082_v40 = vadd.f32 %v1078_v37, %v1067_v39 }
 0x20a   : > { %v1090_v42 = vadd.f32 %v1082_v40, %v2072_v22 }
 0x20b   : > { %v1051_v44 = vpop.f32.mrf.mxu2 }
 0x20c   : > { %v1098_v45 = vmax.f32 %v1090_v42, 0.0  ;;  %v1068_v46 = vmul.f32 %v1064_v41, %v1051_v44 }
 0x20d   : > { %v1034_v47 = vpop.f32.mrf.mxu1 }
 0x20e   : > { %1106 = vst [vmem:[%s2148_s14] sm:$0xff] %v1098_v45  ;;  %v1083_v48 = vadd.f32 %v1079_v43, %v1068_v46  ;;  %v1069_v49 = vmul.f32 %v1063_v36, %v1034_v47 }
 0x210   : > { %v1091_v50 = vadd.f32 %v1083_v48, %v2078_v24  ;;  %v1084_v51 = vadd.f32 %v1078_v37, %v1069_v49 }
 0x212   : > { %v1099_v53 = vmax.f32 %v1091_v50, 0.0  ;;  %v1092_v22 = vadd.f32 %v1084_v51, %v2075_v23 }
 0x213   : > { %v1053_v54 = vpop.f32.mrf.mxu2 }
 0x214   : > { %1107 = vst [vmem:[%s2148_s14 + $0x8] sm:$0xff] %v1099_v53  ;;  %v1100_v55 = vmax.f32 %v1092_v22, 0.0  ;;  %v1070_v56 = vmul.f32 %v1064_v41, %v1053_v54 }
 0x216   : > { %1108 = vst [vmem:[%s2148_s14 + $0x10] sm:$0xff] %v1100_v55  ;;  %v1085_v58 = vadd.f32 %v1079_v43, %v1070_v56 }
 0x218   : > { %v1093_v60 = vadd.f32 %v1085_v58, %v2081_v25 }
 0x21a   : > { %v1101_v62 = vmax.f32 %v1093_v60, 0.0 }
 0x21c   : > { %1109 = vst [vmem:[%s2148_s14 + $0x18] sm:$0xff] %v1101_v62 }
 0x21e   : > { %v1037_v63 = vpop.f32.mrf.mxu1 }
 0x21f   : > { %v1071_v0 = vmul.f32 %v1063_v36, %v1037_v63 }
 0x221   : > { %v1086_v52 = vadd.f32 %v1078_v37, %v1071_v0 }
 0x223   : > { %v1094_v24 = vadd.f32 %v1086_v52, %v2088_v28 }
 0x224   : > { %v1056_v61 = vpop.f32.mrf.mxu2 }
 0x225   : > { %v1102_v23 = vmax.f32 %v1094_v24, 0.0  ;;  %v1072_v1 = vmul.f32 %v1064_v41, %v1056_v61 }
 0x226   : > { %v1039_v2 = vpop.f32.mrf.mxu1 }
 0x227   : > { %1110 = vst [vmem:[%s2148_s14 + $0x20] sm:$0xff] %v1102_v23  ;;  %v1087_v3 = vadd.f32 %v1079_v43, %v1072_v1  ;;  %v1073_v4 = vmul.f32 %v1063_v36, %v1039_v2 }
 0x229   : > { %v1095_v25 = vadd.f32 %v1087_v3, %v2094_v30  ;;  %v1088_v5 = vadd.f32 %v1078_v37, %v1073_v4 }
 0x22b   : > { %v1103_v57 = vmax.f32 %v1095_v25, 0.0  ;;  %v1096_v6 = vadd.f32 %v1088_v5, %v2091_v29 }
 0x22c   : > { %v1058_v8 = vpop.f32.mrf.mxu2 }
 0x22d   : > { %1111 = vst [vmem:[%s2148_s14 + $0x28] sm:$0xff] %v1103_v57  ;;  %v1104_v28 = vmax.f32 %v1096_v6, 0.0  ;;  %v1074_v9 = vmul.f32 %v1064_v41, %v1058_v8 }
 0x22f   : > { %1112 = vst [vmem:[%s2148_s14 + $0x30] sm:$0xff] %v1104_v28  ;;  %v1089_v10 = vadd.f32 %v1079_v43, %v1074_v9 }
 0x231   : > { %v1097_v30 = vadd.f32 %v1089_v10, %v2097_v31 }
 0x233   : > { %v1105_v59 = vmax.f32 %v1097_v30, 0.0 }
 0x235   : > { %1113 = vst [vmem:[%s2148_s14 + $0x38] sm:$0xff] %v1105_v59 }
 0x236   : > { %1840 = shalt.err (!%p1837_p10)
}
 0x237   : > { %s1900_s29 = smov 256   ;;  %s1901_s14 = smov 16  }
 0x238   : > { %1581 = dma.vmem_to_hbm [thread:$0]  (%p2021_p3), %s1129_s16, 1024, %s1131_s10, %s1115_s25, %s1900_s29, %s1900_s29, %s1901_s14  }
 0x239 PF: > { %s1145_s17 = sand.u32 1, %s1875_s21   ;;  %p2212_p12 = scmp.ge.s32.totalorder %s1887_s24, 2 }
 0x23a   : > { %s1146_s30 = scalar_lea.sflag [#allocation4], %s1145_s17 }
 0x23b   : > { %p1601_p13 = pnand %p2212_p12, %p1972_p6 }
 0x23d   : > { %p1602_p0 = pneg %p1601_p13 }
 0x23f   : > { %1870 = dma.done.wait (%p1602_p0), %s1146_s30, 1024  }
 0x240   : > { %1872 = vsyncadd (%p1602_p0), %s1146_s30, 4294966272  ;;  %p21_p5 = scmp.ge.s32.totalorder %s2011_s18, 4   ;;  %s2213_s21 = smov %s1879_s22 }
 0x241   : > { %s2214_s22 = smov %s1883_s23  ;;  %s2215_s23 = smov %s2027_s15 }
 0x242   : > { %s2216_s24 = smov %s2011_s18  ;;  %23 = sbr.rel (!%p21_p5) target bundleno = 7 (0x7), region = 108 }
 0x247   :  { %1152 = vsyncpa [#allocation3], 1 }
 0x248   :  { %1154 = vsyncpa [#allocation3 + $0x1], 1 }
 0x249   :  { %1155 = vsyncpa [#allocation6], 1 }
 0x24a   :  { %1156 = vsyncpa [#allocation9], 1 }
 0x24b   :  { %1157 = vsyncpa [#allocation4], 1 }
 0x24c   :  { %1159 = vsyncpa [#allocation4 + $0x1], 1 }

</bundles_post_ra>
